<compile_context>
chip_gen: v5e
topology: v5e:2x2
jax: 0.10.0
libtpu: 0.0.40
codegen_flags: <defaults>
</compile_context>

<pallas_src>
import functools

import jax
import jax.numpy as jnp
from jax import lax
from jax.experimental import pallas as pl
from jax.experimental.pallas import tpu as pltpu


def mhsa_kernel(x_ref, wqkv_ref, wo_ref, out_ref, *,
                batch, seq_len, num_heads, head_dim, d_out):
    # x_ref:    (B*T, d_in)        batch folded into M
    # wqkv_ref: (d_in, 3*d_out)    [W_q^T * sqrt(hd) | W_k^T | W_v^T]
    # wo_ref:   (d_out, d_out)     out_proj^T
    # out_ref:  (B*T, d_out)
    x = x_ref[...]

    # One fused QKV projection: single MXU push, 3*d_out lanes wide.
    qkv = jnp.dot(x, wqkv_ref[...], preferred_element_type=jnp.float32)  # (B*T, 3*d_out)

    # Causal predicate built once (strictly above diagonal -> masked).
    row = lax.broadcasted_iota(jnp.int32, (seq_len, seq_len), 0)
    col = lax.broadcasted_iota(jnp.int32, (seq_len, seq_len), 1)
    masked = col > row
    neg_inf = jnp.float32(-jnp.inf)

    contract_last = (((1,), (1,)), ((), ()))  # q @ k.T without explicit transpose
    wo = wo_ref[...]

    for b in range(batch):                      # static loops: B*H tiny tiles
        r0 = b * seq_len
        acc = jnp.zeros((seq_len, d_out), jnp.float32)
        for h in range(num_heads):
            lo = h * head_dim
            q_h = qkv[r0:r0 + seq_len, lo:lo + head_dim]                  # pre-scaled Q
            k_h = qkv[r0:r0 + seq_len, d_out + lo:d_out + lo + head_dim]
            v_h = qkv[r0:r0 + seq_len, 2 * d_out + lo:2 * d_out + lo + head_dim]

            scores = lax.dot_general(q_h, k_h, contract_last,
                                     preferred_element_type=jnp.float32)  # (T, T)
            scores = jnp.where(masked, neg_inf, scores)

            m = jnp.max(scores, axis=-1, keepdims=True)
            e = jnp.exp(scores - m)
            inv = pl.reciprocal(jnp.sum(e, axis=-1, keepdims=True), approx=False)
            w = e * inv
            # dropout(attn_weights) -> identity in eval mode

            ctx_h = jnp.dot(w, v_h, preferred_element_type=jnp.float32)   # (T, hd)
            # Per-head out-projection accumulation through a sublane (row) slice of
            # wo: no lane-masked column stores, no context slab, no VMEM round trip.
            acc = acc + jnp.dot(ctx_h, wo[lo:lo + head_dim, :],
                                preferred_element_type=jnp.float32)
        out_ref[r0:r0 + seq_len, :] = acc


def mhsa_forward(x, wq, wk, wv, wo, *, num_heads):
    """x: (B, T, d_in); weights in PyTorch layout (d_out, d_in) / (d_out, d_out)."""
    B, T, d_in = x.shape
    d_out = wq.shape[0]
    head_dim = d_out // num_heads
    scale = jnp.float32(head_dim) ** 0.5   # module multiplies scores by sqrt(head_dim)

    # Fuse + pre-transpose the QKV weights once; fold the score scale into Q columns.
    wqkv = jnp.concatenate([wq.T * scale, wk.T, wv.T], axis=1)   # (d_in, 3*d_out)
    wo_t = wo.T                                                  # (d_out, d_out)

    x2 = x.reshape(B * T, d_in)   # fold batch into the matmul M dimension

    kernel = functools.partial(
        mhsa_kernel, batch=B, seq_len=T, num_heads=num_heads,
        head_dim=head_dim, d_out=d_out)

    out2 = pl.pallas_call(
        kernel,
        out_shape=jax.ShapeDtypeStruct((B * T, d_out), jnp.float32),
        # Single invocation (no grid): whole problem is a few KB, so grid-step
        # pipeline overhead would dominate.  Whole arrays resident in VMEM.
        in_specs=[
            pl.BlockSpec(memory_space=pltpu.MemorySpace.VMEM),   # x  (B*T, d_in)
            pl.BlockSpec(memory_space=pltpu.MemorySpace.VMEM),   # fused W_qkv^T
            pl.BlockSpec(memory_space=pltpu.MemorySpace.VMEM),   # out_proj^T
        ],
        out_specs=pl.BlockSpec(memory_space=pltpu.MemorySpace.VMEM),
    )(x2, wqkv, wo_t)
    return out2.reshape(B, T, d_out)


def reference_forward(x, wq, wk, wv, wo, *, num_heads):
    """Pure-JAX mirror of the PyTorch forward (eval mode) for verification."""
    B, T, d_in = x.shape
    d_out = wq.shape[0]
    hd = d_out // num_heads
    mask = jnp.triu(jnp.ones((T, T), jnp.float32), k=1)
    q = (x @ wq.T).reshape(B, T, num_heads, hd).transpose(0, 2, 1, 3)
    k = (x @ wk.T).reshape(B, T, num_heads, hd).transpose(0, 2, 1, 3)
    v = (x @ wv.T).reshape(B, T, num_heads, hd).transpose(0, 2, 1, 3)
    scores = jnp.einsum("bhqd,bhkd->bhqk", q, k)
    scores = jnp.where(mask[None, None] > 0, -jnp.inf, scores)
    scores = scores / (hd ** (-0.5))            # same non-standard scaling as the module
    w = jax.nn.softmax(scores, axis=-1)
    ctx = jnp.einsum("bhqk,bhkd->bhqd", w, v).transpose(0, 2, 1, 3).reshape(B, T, d_out)
    return ctx @ wo.T


if __name__ == "__main__":
    # Module config (small, consistent with the forward pass)
    B = 2
    d_in = 32
    d_out = 32
    context_length = 8
    num_heads = 4

    key = jax.random.PRNGKey(0)
    kx, kq, kk, kv, ko = jax.random.split(key, 5)

    # Deterministic parameter init (nn.Linear-style uniform, bias=False)
    bound_in = 1.0 / (d_in ** 0.5)
    bound_out = 1.0 / (d_out ** 0.5)
    wq = jax.random.uniform(kq, (d_out, d_in), jnp.float32, -bound_in, bound_in)
    wk = jax.random.uniform(kk, (d_out, d_in), jnp.float32, -bound_in, bound_in)
    wv = jax.random.uniform(kv, (d_out, d_in), jnp.float32, -bound_in, bound_in)
    wo = jax.random.uniform(ko, (d_out, d_out), jnp.float32, -bound_out, bound_out)

    x = jax.random.normal(kx, (B, context_length, d_in), jnp.float32)

    out = mhsa_forward(x, wq, wk, wv, wo, num_heads=num_heads)
    out = jax.block_until_ready(out)

    ref = reference_forward(x, wq, wk, wv, wo, num_heads=num_heads)
    assert out.shape == (B, context_length, d_out)
    assert jnp.allclose(out, ref, atol=1e-4, rtol=1e-4), "mismatch vs. JAX reference"

    print("KERNEL_OK")
</pallas_src>

<mosaic_0001>
module attributes {stable_mosaic.version = 11 : i64} {
  func.func @mhsa_kernel(%arg0: memref<16x32xf32, #tpu.memory_space<vmem>>, %arg1: memref<32x96xf32, #tpu.memory_space<vmem>>, %arg2: memref<32x32xf32, #tpu.memory_space<vmem>>, %arg3: memref<16x32xf32, #tpu.memory_space<vmem>>) attributes {dimension_semantics = [], scalar_prefetch = 0 : i64, scratch_operands = 0 : i64, tpu.core_type = #tpu.core_type<tc>} {
    %c0 = arith.constant 0 : index
    %c0_0 = arith.constant 0 : index
    %0 = vector.load %arg0[%c0, %c0_0] : memref<16x32xf32, #tpu.memory_space<vmem>>, vector<16x32xf32>
    %c0_1 = arith.constant 0 : index
    %c0_2 = arith.constant 0 : index
    %1 = vector.load %arg1[%c0_1, %c0_2] : memref<32x96xf32, #tpu.memory_space<vmem>>, vector<32x96xf32>
    %cst = arith.constant dense<0.000000e+00> : vector<16x96xf32>
    %2 = tpu.matmul %0, %1, %cst {dimension_numbers = #tpu.dot_dimension_numbers<[1], [0], [0], [1], [0, 0, 1, 1], [], []>} : vector<16x32xf32>, vector<32x96xf32>, vector<16x96xf32> -> vector<16x96xf32>
    %3 = tpu.iota {dimensions = array<i32: 0>} : vector<8x8xi32>
    %4 = tpu.iota {dimensions = array<i32: 1>} : vector<8x8xi32>
    %5 = arith.cmpi sgt, %4, %3 : vector<8x8xi32>
    %c0_3 = arith.constant 0 : index
    %c0_4 = arith.constant 0 : index
    %6 = vector.load %arg2[%c0_3, %c0_4] : memref<32x32xf32, #tpu.memory_space<vmem>>, vector<32x32xf32>
    %cst_5 = arith.constant 0.000000e+00 : f32
    %7 = vector.broadcast %cst_5 : f32 to vector<8x32xf32>
    %8 = vector.extract_strided_slice %2 {offsets = [0, 0], sizes = [8, 8], strides = [1, 1]} : vector<16x96xf32> to vector<8x8xf32>
    %9 = vector.extract_strided_slice %2 {offsets = [0, 32], sizes = [8, 8], strides = [1, 1]} : vector<16x96xf32> to vector<8x8xf32>
    %10 = vector.extract_strided_slice %2 {offsets = [0, 64], sizes = [8, 8], strides = [1, 1]} : vector<16x96xf32> to vector<8x8xf32>
    %cst_6 = arith.constant dense<0.000000e+00> : vector<8x8xf32>
    %11 = tpu.matmul %8, %9, %cst_6 {dimension_numbers = #tpu.dot_dimension_numbers<[1], [1], [0], [0], [0, 0, 1, 0], [], []>} : vector<8x8xf32>, vector<8x8xf32>, vector<8x8xf32> -> vector<8x8xf32>
    %cst_7 = arith.constant 0xFF800000 : f32
    %12 = vector.broadcast %cst_7 : f32 to vector<8x8xf32>
    %13 = arith.select %5, %12, %11 : vector<8x8xi1>, vector<8x8xf32>
    %cst_8 = arith.constant dense<0xFF800000> : vector<8xf32>
    %14 = vector.multi_reduction <maximumf>, %13, %cst_8 [1] : vector<8x8xf32> to vector<8xf32>
    %15 = vector.shape_cast %14 : vector<8xf32> to vector<8x1xf32>
    %16 = vector.broadcast %15 : vector<8x1xf32> to vector<8x8xf32>
    %17 = arith.subf %13, %16 : vector<8x8xf32>
    %18 = math.exp %17 : vector<8x8xf32>
    %cst_9 = arith.constant dense<0.000000e+00> : vector<8xf32>
    %19 = vector.multi_reduction <add>, %18, %cst_9 [1] : vector<8x8xf32> to vector<8xf32>
    %20 = vector.shape_cast %19 : vector<8xf32> to vector<8x1xf32>
    %21 = tpu.reciprocal %20 : vector<8x1xf32> -> vector<8x1xf32>
    %22 = vector.broadcast %21 : vector<8x1xf32> to vector<8x8xf32>
    %23 = arith.mulf %18, %22 : vector<8x8xf32>
    %cst_10 = arith.constant dense<0.000000e+00> : vector<8x8xf32>
    %24 = tpu.matmul %23, %10, %cst_10 {dimension_numbers = #tpu.dot_dimension_numbers<[1], [0], [0], [1], [0, 0, 1, 1], [], []>} : vector<8x8xf32>, vector<8x8xf32>, vector<8x8xf32> -> vector<8x8xf32>
    %25 = vector.extract_strided_slice %6 {offsets = [0, 0], sizes = [8, 32], strides = [1, 1]} : vector<32x32xf32> to vector<8x32xf32>
    %cst_11 = arith.constant dense<0.000000e+00> : vector<8x32xf32>
    %26 = tpu.matmul %24, %25, %cst_11 {dimension_numbers = #tpu.dot_dimension_numbers<[1], [0], [0], [1], [0, 0, 1, 1], [], []>} : vector<8x8xf32>, vector<8x32xf32>, vector<8x32xf32> -> vector<8x32xf32>
    %27 = arith.addf %7, %26 : vector<8x32xf32>
    %28 = vector.extract_strided_slice %2 {offsets = [0, 8], sizes = [8, 8], strides = [1, 1]} : vector<16x96xf32> to vector<8x8xf32>
    %29 = vector.extract_strided_slice %2 {offsets = [0, 40], sizes = [8, 8], strides = [1, 1]} : vector<16x96xf32> to vector<8x8xf32>
    %30 = vector.extract_strided_slice %2 {offsets = [0, 72], sizes = [8, 8], strides = [1, 1]} : vector<16x96xf32> to vector<8x8xf32>
    %cst_12 = arith.constant dense<0.000000e+00> : vector<8x8xf32>
    %31 = tpu.matmul %28, %29, %cst_12 {dimension_numbers = #tpu.dot_dimension_numbers<[1], [1], [0], [0], [0, 0, 1, 0], [], []>} : vector<8x8xf32>, vector<8x8xf32>, vector<8x8xf32> -> vector<8x8xf32>
    %cst_13 = arith.constant 0xFF800000 : f32
    %32 = vector.broadcast %cst_13 : f32 to vector<8x8xf32>
    %33 = arith.select %5, %32, %31 : vector<8x8xi1>, vector<8x8xf32>
    %cst_14 = arith.constant dense<0xFF800000> : vector<8xf32>
    %34 = vector.multi_reduction <maximumf>, %33, %cst_14 [1] : vector<8x8xf32> to vector<8xf32>
    %35 = vector.shape_cast %34 : vector<8xf32> to vector<8x1xf32>
    %36 = vector.broadcast %35 : vector<8x1xf32> to vector<8x8xf32>
    %37 = arith.subf %33, %36 : vector<8x8xf32>
    %38 = math.exp %37 : vector<8x8xf32>
    %cst_15 = arith.constant dense<0.000000e+00> : vector<8xf32>
    %39 = vector.multi_reduction <add>, %38, %cst_15 [1] : vector<8x8xf32> to vector<8xf32>
    %40 = vector.shape_cast %39 : vector<8xf32> to vector<8x1xf32>
    %41 = tpu.reciprocal %40 : vector<8x1xf32> -> vector<8x1xf32>
    %42 = vector.broadcast %41 : vector<8x1xf32> to vector<8x8xf32>
    %43 = arith.mulf %38, %42 : vector<8x8xf32>
    %cst_16 = arith.constant dense<0.000000e+00> : vector<8x8xf32>
    %44 = tpu.matmul %43, %30, %cst_16 {dimension_numbers = #tpu.dot_dimension_numbers<[1], [0], [0], [1], [0, 0, 1, 1], [], []>} : vector<8x8xf32>, vector<8x8xf32>, vector<8x8xf32> -> vector<8x8xf32>
    %45 = vector.extract_strided_slice %6 {offsets = [8, 0], sizes = [8, 32], strides = [1, 1]} : vector<32x32xf32> to vector<8x32xf32>
    %cst_17 = arith.constant dense<0.000000e+00> : vector<8x32xf32>
    %46 = tpu.matmul %44, %45, %cst_17 {dimension_numbers = #tpu.dot_dimension_numbers<[1], [0], [0], [1], [0, 0, 1, 1], [], []>} : vector<8x8xf32>, vector<8x32xf32>, vector<8x32xf32> -> vector<8x32xf32>
    %47 = arith.addf %27, %46 : vector<8x32xf32>
    %48 = vector.extract_strided_slice %2 {offsets = [0, 16], sizes = [8, 8], strides = [1, 1]} : vector<16x96xf32> to vector<8x8xf32>
    %49 = vector.extract_strided_slice %2 {offsets = [0, 48], sizes = [8, 8], strides = [1, 1]} : vector<16x96xf32> to vector<8x8xf32>
    %50 = vector.extract_strided_slice %2 {offsets = [0, 80], sizes = [8, 8], strides = [1, 1]} : vector<16x96xf32> to vector<8x8xf32>
    %cst_18 = arith.constant dense<0.000000e+00> : vector<8x8xf32>
    %51 = tpu.matmul %48, %49, %cst_18 {dimension_numbers = #tpu.dot_dimension_numbers<[1], [1], [0], [0], [0, 0, 1, 0], [], []>} : vector<8x8xf32>, vector<8x8xf32>, vector<8x8xf32> -> vector<8x8xf32>
    %cst_19 = arith.constant 0xFF800000 : f32
    %52 = vector.broadcast %cst_19 : f32 to vector<8x8xf32>
    %53 = arith.select %5, %52, %51 : vector<8x8xi1>, vector<8x8xf32>
    %cst_20 = arith.constant dense<0xFF800000> : vector<8xf32>
    %54 = vector.multi_reduction <maximumf>, %53, %cst_20 [1] : vector<8x8xf32> to vector<8xf32>
    %55 = vector.shape_cast %54 : vector<8xf32> to vector<8x1xf32>
    %56 = vector.broadcast %55 : vector<8x1xf32> to vector<8x8xf32>
    %57 = arith.subf %53, %56 : vector<8x8xf32>
    %58 = math.exp %57 : vector<8x8xf32>
    %cst_21 = arith.constant dense<0.000000e+00> : vector<8xf32>
    %59 = vector.multi_reduction <add>, %58, %cst_21 [1] : vector<8x8xf32> to vector<8xf32>
    %60 = vector.shape_cast %59 : vector<8xf32> to vector<8x1xf32>
    %61 = tpu.reciprocal %60 : vector<8x1xf32> -> vector<8x1xf32>
    %62 = vector.broadcast %61 : vector<8x1xf32> to vector<8x8xf32>
    %63 = arith.mulf %58, %62 : vector<8x8xf32>
    %cst_22 = arith.constant dense<0.000000e+00> : vector<8x8xf32>
    %64 = tpu.matmul %63, %50, %cst_22 {dimension_numbers = #tpu.dot_dimension_numbers<[1], [0], [0], [1], [0, 0, 1, 1], [], []>} : vector<8x8xf32>, vector<8x8xf32>, vector<8x8xf32> -> vector<8x8xf32>
    %65 = vector.extract_strided_slice %6 {offsets = [16, 0], sizes = [8, 32], strides = [1, 1]} : vector<32x32xf32> to vector<8x32xf32>
    %cst_23 = arith.constant dense<0.000000e+00> : vector<8x32xf32>
    %66 = tpu.matmul %64, %65, %cst_23 {dimension_numbers = #tpu.dot_dimension_numbers<[1], [0], [0], [1], [0, 0, 1, 1], [], []>} : vector<8x8xf32>, vector<8x32xf32>, vector<8x32xf32> -> vector<8x32xf32>
    %67 = arith.addf %47, %66 : vector<8x32xf32>
    %68 = vector.extract_strided_slice %2 {offsets = [0, 24], sizes = [8, 8], strides = [1, 1]} : vector<16x96xf32> to vector<8x8xf32>
    %69 = vector.extract_strided_slice %2 {offsets = [0, 56], sizes = [8, 8], strides = [1, 1]} : vector<16x96xf32> to vector<8x8xf32>
    %70 = vector.extract_strided_slice %2 {offsets = [0, 88], sizes = [8, 8], strides = [1, 1]} : vector<16x96xf32> to vector<8x8xf32>
    %cst_24 = arith.constant dense<0.000000e+00> : vector<8x8xf32>
    %71 = tpu.matmul %68, %69, %cst_24 {dimension_numbers = #tpu.dot_dimension_numbers<[1], [1], [0], [0], [0, 0, 1, 0], [], []>} : vector<8x8xf32>, vector<8x8xf32>, vector<8x8xf32> -> vector<8x8xf32>
    %cst_25 = arith.constant 0xFF800000 : f32
    %72 = vector.broadcast %cst_25 : f32 to vector<8x8xf32>
    %73 = arith.select %5, %72, %71 : vector<8x8xi1>, vector<8x8xf32>
    %cst_26 = arith.constant dense<0xFF800000> : vector<8xf32>
    %74 = vector.multi_reduction <maximumf>, %73, %cst_26 [1] : vector<8x8xf32> to vector<8xf32>
    %75 = vector.shape_cast %74 : vector<8xf32> to vector<8x1xf32>
    %76 = vector.broadcast %75 : vector<8x1xf32> to vector<8x8xf32>
    %77 = arith.subf %73, %76 : vector<8x8xf32>
    %78 = math.exp %77 : vector<8x8xf32>
    %cst_27 = arith.constant dense<0.000000e+00> : vector<8xf32>
    %79 = vector.multi_reduction <add>, %78, %cst_27 [1] : vector<8x8xf32> to vector<8xf32>
    %80 = vector.shape_cast %79 : vector<8xf32> to vector<8x1xf32>
    %81 = tpu.reciprocal %80 : vector<8x1xf32> -> vector<8x1xf32>
    %82 = vector.broadcast %81 : vector<8x1xf32> to vector<8x8xf32>
    %83 = arith.mulf %78, %82 : vector<8x8xf32>
    %cst_28 = arith.constant dense<0.000000e+00> : vector<8x8xf32>
    %84 = tpu.matmul %83, %70, %cst_28 {dimension_numbers = #tpu.dot_dimension_numbers<[1], [0], [0], [1], [0, 0, 1, 1], [], []>} : vector<8x8xf32>, vector<8x8xf32>, vector<8x8xf32> -> vector<8x8xf32>
    %85 = vector.extract_strided_slice %6 {offsets = [24, 0], sizes = [8, 32], strides = [1, 1]} : vector<32x32xf32> to vector<8x32xf32>
    %cst_29 = arith.constant dense<0.000000e+00> : vector<8x32xf32>
    %86 = tpu.matmul %84, %85, %cst_29 {dimension_numbers = #tpu.dot_dimension_numbers<[1], [0], [0], [1], [0, 0, 1, 1], [], []>} : vector<8x8xf32>, vector<8x32xf32>, vector<8x32xf32> -> vector<8x32xf32>
    %87 = arith.addf %67, %86 : vector<8x32xf32>
    %c0_30 = arith.constant 0 : index
    %c0_31 = arith.constant 0 : index
    %88 = vector.load %arg3[%c0_30, %c0_31] : memref<16x32xf32, #tpu.memory_space<vmem>>, vector<8x32xf32>
    tpu.vector_store %arg3[%c0_30, %c0_31], %87 {strides = array<i32>} : memref<16x32xf32, #tpu.memory_space<vmem>>, vector<8x32xf32>,
    %cst_32 = arith.constant 0.000000e+00 : f32
    %89 = vector.broadcast %cst_32 : f32 to vector<8x32xf32>
    %90 = vector.extract_strided_slice %2 {offsets = [8, 0], sizes = [8, 8], strides = [1, 1]} : vector<16x96xf32> to vector<8x8xf32>
    %91 = vector.extract_strided_slice %2 {offsets = [8, 32], sizes = [8, 8], strides = [1, 1]} : vector<16x96xf32> to vector<8x8xf32>
    %92 = vector.extract_strided_slice %2 {offsets = [8, 64], sizes = [8, 8], strides = [1, 1]} : vector<16x96xf32> to vector<8x8xf32>
    %cst_33 = arith.constant dense<0.000000e+00> : vector<8x8xf32>
    %93 = tpu.matmul %90, %91, %cst_33 {dimension_numbers = #tpu.dot_dimension_numbers<[1], [1], [0], [0], [0, 0, 1, 0], [], []>} : vector<8x8xf32>, vector<8x8xf32>, vector<8x8xf32> -> vector<8x8xf32>
    %cst_34 = arith.constant 0xFF800000 : f32
    %94 = vector.broadcast %cst_34 : f32 to vector<8x8xf32>
    %95 = arith.select %5, %94, %93 : vector<8x8xi1>, vector<8x8xf32>
    %cst_35 = arith.constant dense<0xFF800000> : vector<8xf32>
    %96 = vector.multi_reduction <maximumf>, %95, %cst_35 [1] : vector<8x8xf32> to vector<8xf32>
    %97 = vector.shape_cast %96 : vector<8xf32> to vector<8x1xf32>
    %98 = vector.broadcast %97 : vector<8x1xf32> to vector<8x8xf32>
    %99 = arith.subf %95, %98 : vector<8x8xf32>
    %100 = math.exp %99 : vector<8x8xf32>
    %cst_36 = arith.constant dense<0.000000e+00> : vector<8xf32>
    %101 = vector.multi_reduction <add>, %100, %cst_36 [1] : vector<8x8xf32> to vector<8xf32>
    %102 = vector.shape_cast %101 : vector<8xf32> to vector<8x1xf32>
    %103 = tpu.reciprocal %102 : vector<8x1xf32> -> vector<8x1xf32>
    %104 = vector.broadcast %103 : vector<8x1xf32> to vector<8x8xf32>
    %105 = arith.mulf %100, %104 : vector<8x8xf32>
    %cst_37 = arith.constant dense<0.000000e+00> : vector<8x8xf32>
    %106 = tpu.matmul %105, %92, %cst_37 {dimension_numbers = #tpu.dot_dimension_numbers<[1], [0], [0], [1], [0, 0, 1, 1], [], []>} : vector<8x8xf32>, vector<8x8xf32>, vector<8x8xf32> -> vector<8x8xf32>
    %107 = vector.extract_strided_slice %6 {offsets = [0, 0], sizes = [8, 32], strides = [1, 1]} : vector<32x32xf32> to vector<8x32xf32>
    %cst_38 = arith.constant dense<0.000000e+00> : vector<8x32xf32>
    %108 = tpu.matmul %106, %107, %cst_38 {dimension_numbers = #tpu.dot_dimension_numbers<[1], [0], [0], [1], [0, 0, 1, 1], [], []>} : vector<8x8xf32>, vector<8x32xf32>, vector<8x32xf32> -> vector<8x32xf32>
    %109 = arith.addf %89, %108 : vector<8x32xf32>
    %110 = vector.extract_strided_slice %2 {offsets = [8, 8], sizes = [8, 8], strides = [1, 1]} : vector<16x96xf32> to vector<8x8xf32>
    %111 = vector.extract_strided_slice %2 {offsets = [8, 40], sizes = [8, 8], strides = [1, 1]} : vector<16x96xf32> to vector<8x8xf32>
    %112 = vector.extract_strided_slice %2 {offsets = [8, 72], sizes = [8, 8], strides = [1, 1]} : vector<16x96xf32> to vector<8x8xf32>
    %cst_39 = arith.constant dense<0.000000e+00> : vector<8x8xf32>
    %113 = tpu.matmul %110, %111, %cst_39 {dimension_numbers = #tpu.dot_dimension_numbers<[1], [1], [0], [0], [0, 0, 1, 0], [], []>} : vector<8x8xf32>, vector<8x8xf32>, vector<8x8xf32> -> vector<8x8xf32>
    %cst_40 = arith.constant 0xFF800000 : f32
    %114 = vector.broadcast %cst_40 : f32 to vector<8x8xf32>
    %115 = arith.select %5, %114, %113 : vector<8x8xi1>, vector<8x8xf32>
    %cst_41 = arith.constant dense<0xFF800000> : vector<8xf32>
    %116 = vector.multi_reduction <maximumf>, %115, %cst_41 [1] : vector<8x8xf32> to vector<8xf32>
    %117 = vector.shape_cast %116 : vector<8xf32> to vector<8x1xf32>
    %118 = vector.broadcast %117 : vector<8x1xf32> to vector<8x8xf32>
    %119 = arith.subf %115, %118 : vector<8x8xf32>
    %120 = math.exp %119 : vector<8x8xf32>
    %cst_42 = arith.constant dense<0.000000e+00> : vector<8xf32>
    %121 = vector.multi_reduction <add>, %120, %cst_42 [1] : vector<8x8xf32> to vector<8xf32>
    %122 = vector.shape_cast %121 : vector<8xf32> to vector<8x1xf32>
    %123 = tpu.reciprocal %122 : vector<8x1xf32> -> vector<8x1xf32>
    %124 = vector.broadcast %123 : vector<8x1xf32> to vector<8x8xf32>
    %125 = arith.mulf %120, %124 : vector<8x8xf32>
    %cst_43 = arith.constant dense<0.000000e+00> : vector<8x8xf32>
    %126 = tpu.matmul %125, %112, %cst_43 {dimension_numbers = #tpu.dot_dimension_numbers<[1], [0], [0], [1], [0, 0, 1, 1], [], []>} : vector<8x8xf32>, vector<8x8xf32>, vector<8x8xf32> -> vector<8x8xf32>
    %127 = vector.extract_strided_slice %6 {offsets = [8, 0], sizes = [8, 32], strides = [1, 1]} : vector<32x32xf32> to vector<8x32xf32>
    %cst_44 = arith.constant dense<0.000000e+00> : vector<8x32xf32>
    %128 = tpu.matmul %126, %127, %cst_44 {dimension_numbers = #tpu.dot_dimension_numbers<[1], [0], [0], [1], [0, 0, 1, 1], [], []>} : vector<8x8xf32>, vector<8x32xf32>, vector<8x32xf32> -> vector<8x32xf32>
    %129 = arith.addf %109, %128 : vector<8x32xf32>
    %130 = vector.extract_strided_slice %2 {offsets = [8, 16], sizes = [8, 8], strides = [1, 1]} : vector<16x96xf32> to vector<8x8xf32>
    %131 = vector.extract_strided_slice %2 {offsets = [8, 48], sizes = [8, 8], strides = [1, 1]} : vector<16x96xf32> to vector<8x8xf32>
    %132 = vector.extract_strided_slice %2 {offsets = [8, 80], sizes = [8, 8], strides = [1, 1]} : vector<16x96xf32> to vector<8x8xf32>
    %cst_45 = arith.constant dense<0.000000e+00> : vector<8x8xf32>
    %133 = tpu.matmul %130, %131, %cst_45 {dimension_numbers = #tpu.dot_dimension_numbers<[1], [1], [0], [0], [0, 0, 1, 0], [], []>} : vector<8x8xf32>, vector<8x8xf32>, vector<8x8xf32> -> vector<8x8xf32>
    %cst_46 = arith.constant 0xFF800000 : f32
    %134 = vector.broadcast %cst_46 : f32 to vector<8x8xf32>
    %135 = arith.select %5, %134, %133 : vector<8x8xi1>, vector<8x8xf32>
    %cst_47 = arith.constant dense<0xFF800000> : vector<8xf32>
    %136 = vector.multi_reduction <maximumf>, %135, %cst_47 [1] : vector<8x8xf32> to vector<8xf32>
    %137 = vector.shape_cast %136 : vector<8xf32> to vector<8x1xf32>
    %138 = vector.broadcast %137 : vector<8x1xf32> to vector<8x8xf32>
    %139 = arith.subf %135, %138 : vector<8x8xf32>
    %140 = math.exp %139 : vector<8x8xf32>
    %cst_48 = arith.constant dense<0.000000e+00> : vector<8xf32>
    %141 = vector.multi_reduction <add>, %140, %cst_48 [1] : vector<8x8xf32> to vector<8xf32>
    %142 = vector.shape_cast %141 : vector<8xf32> to vector<8x1xf32>
    %143 = tpu.reciprocal %142 : vector<8x1xf32> -> vector<8x1xf32>
    %144 = vector.broadcast %143 : vector<8x1xf32> to vector<8x8xf32>
    %145 = arith.mulf %140, %144 : vector<8x8xf32>
    %cst_49 = arith.constant dense<0.000000e+00> : vector<8x8xf32>
    %146 = tpu.matmul %145, %132, %cst_49 {dimension_numbers = #tpu.dot_dimension_numbers<[1], [0], [0], [1], [0, 0, 1, 1], [], []>} : vector<8x8xf32>, vector<8x8xf32>, vector<8x8xf32> -> vector<8x8xf32>
    %147 = vector.extract_strided_slice %6 {offsets = [16, 0], sizes = [8, 32], strides = [1, 1]} : vector<32x32xf32> to vector<8x32xf32>
    %cst_50 = arith.constant dense<0.000000e+00> : vector<8x32xf32>
    %148 = tpu.matmul %146, %147, %cst_50 {dimension_numbers = #tpu.dot_dimension_numbers<[1], [0], [0], [1], [0, 0, 1, 1], [], []>} : vector<8x8xf32>, vector<8x32xf32>, vector<8x32xf32> -> vector<8x32xf32>
    %149 = arith.addf %129, %148 : vector<8x32xf32>
    %150 = vector.extract_strided_slice %2 {offsets = [8, 24], sizes = [8, 8], strides = [1, 1]} : vector<16x96xf32> to vector<8x8xf32>
    %151 = vector.extract_strided_slice %2 {offsets = [8, 56], sizes = [8, 8], strides = [1, 1]} : vector<16x96xf32> to vector<8x8xf32>
    %152 = vector.extract_strided_slice %2 {offsets = [8, 88], sizes = [8, 8], strides = [1, 1]} : vector<16x96xf32> to vector<8x8xf32>
    %cst_51 = arith.constant dense<0.000000e+00> : vector<8x8xf32>
    %153 = tpu.matmul %150, %151, %cst_51 {dimension_numbers = #tpu.dot_dimension_numbers<[1], [1], [0], [0], [0, 0, 1, 0], [], []>} : vector<8x8xf32>, vector<8x8xf32>, vector<8x8xf32> -> vector<8x8xf32>
    %cst_52 = arith.constant 0xFF800000 : f32
    %154 = vector.broadcast %cst_52 : f32 to vector<8x8xf32>
    %155 = arith.select %5, %154, %153 : vector<8x8xi1>, vector<8x8xf32>
    %cst_53 = arith.constant dense<0xFF800000> : vector<8xf32>
    %156 = vector.multi_reduction <maximumf>, %155, %cst_53 [1] : vector<8x8xf32> to vector<8xf32>
    %157 = vector.shape_cast %156 : vector<8xf32> to vector<8x1xf32>
    %158 = vector.broadcast %157 : vector<8x1xf32> to vector<8x8xf32>
    %159 = arith.subf %155, %158 : vector<8x8xf32>
    %160 = math.exp %159 : vector<8x8xf32>
    %cst_54 = arith.constant dense<0.000000e+00> : vector<8xf32>
    %161 = vector.multi_reduction <add>, %160, %cst_54 [1] : vector<8x8xf32> to vector<8xf32>
    %162 = vector.shape_cast %161 : vector<8xf32> to vector<8x1xf32>
    %163 = tpu.reciprocal %162 : vector<8x1xf32> -> vector<8x1xf32>
    %164 = vector.broadcast %163 : vector<8x1xf32> to vector<8x8xf32>
    %165 = arith.mulf %160, %164 : vector<8x8xf32>
    %cst_55 = arith.constant dense<0.000000e+00> : vector<8x8xf32>
    %166 = tpu.matmul %165, %152, %cst_55 {dimension_numbers = #tpu.dot_dimension_numbers<[1], [0], [0], [1], [0, 0, 1, 1], [], []>} : vector<8x8xf32>, vector<8x8xf32>, vector<8x8xf32> -> vector<8x8xf32>
    %167 = vector.extract_strided_slice %6 {offsets = [24, 0], sizes = [8, 32], strides = [1, 1]} : vector<32x32xf32> to vector<8x32xf32>
    %cst_56 = arith.constant dense<0.000000e+00> : vector<8x32xf32>
    %168 = tpu.matmul %166, %167, %cst_56 {dimension_numbers = #tpu.dot_dimension_numbers<[1], [0], [0], [1], [0, 0, 1, 1], [], []>} : vector<8x8xf32>, vector<8x32xf32>, vector<8x32xf32> -> vector<8x32xf32>
    %169 = arith.addf %149, %168 : vector<8x32xf32>
    %c8 = arith.constant 8 : index
    %c0_57 = arith.constant 0 : index
    %170 = vector.load %arg3[%c8, %c0_57] : memref<16x32xf32, #tpu.memory_space<vmem>>, vector<8x32xf32>
    tpu.vector_store %arg3[%c8, %c0_57], %169 {strides = array<i32>} : memref<16x32xf32, #tpu.memory_space<vmem>>, vector<8x32xf32>,
    return
  }
}

</mosaic_0001>

<bundles_post_ra>
// kernel: tpu_custom_call.1
= control target key start
LH: loop header
LB: loop body
LE: loop exit
PB: predicated region body
PF: predicated region fallthrough
CT: control target
= control target key end

     0   :  { %8 = vsyncpa [#allocation3], 0  ;;  %s1333_s0 = inlined_call_operand.hbm [shape: f32[16,32], index: 0, kind: input, shape index: {}]   ;;  %s1334_s1 = inlined_call_operand.hbm [shape: f32[32,96], index: 1, kind: input, shape index: {}]   ;;  %s1335_s2 = inlined_call_operand.hbm [shape: f32[32,32], index: 2, kind: input, shape index: {}]   ;;  %s1336_s3 = inlined_call_operand.hbm [shape: f32[16,32], index: 3, kind: output, shape index: {}]  }
   0x1   :  { %9 = vsyncpa [#allocation6], 0 }
   0x2   :  { %10 = vsyncpa [#allocation4], 0  ;;  %s28_s14 = sshll.u32 %s1334_s1, 4  ;;  %s1133_s15 = smov [#allocation5]   ;;  %s29_s14 = int_to_ptr.hbm [resolvable:$true] %s28_s14 }
   0x3   :  { %s30_s16 = sshll.u32 %s1133_s15, 4  ;;  %s15_s19 = sshll.u32 %s1333_s0, 4  ;;  %s31_s16 = int_to_ptr.vmem [resolvable:$true] %s30_s16  ;;  %s16_s19 = int_to_ptr.hbm [resolvable:$true] %s15_s19 }
   0x4   :  { %s1134_s20 = smov 128   ;;  %s1135_s21 = smov 8  }
   0x5   :  { %36 = dma.hbm_to_vmem [thread:$0]  %s29_s14, 512, %s31_s16, [#allocation6], %s1134_s20, %s1134_s20, %s1135_s21  }
   0x6   :  { %s1136_s22 = smov [#allocation2]   ;;  %s41_s1 = sshll.u32 %s1335_s2, 4  ;;  %s42_s1 = int_to_ptr.hbm [resolvable:$true] %s41_s1 }
   0x7   :  { %s17_s23 = sshll.u32 %s1136_s22, 4  ;;  %s1137_s0 = smov [#allocation7]   ;;  %s18_s23 = int_to_ptr.vmem [resolvable:$true] %s17_s23 }
   0x8   :  { %23 = dma.hbm_to_vmem [thread:$0]  %s16_s19, 256, %s18_s23, [#allocation3], %s1134_s20, %s1134_s20, %s1135_s21  }
   0x9   :  { %s43_s26 = sshll.u32 %s1137_s0, 4  ;;  %s44_s26 = int_to_ptr.vmem [resolvable:$true] %s43_s26 }
   0xa   :  { %49 = dma.hbm_to_vmem [thread:$0]  %s42_s1, 512, %s44_s26, [#allocation6], %s1134_s20, %s1134_s20, %s1135_s21  }
   0xb   :  { %1127 = dma.done.wait [#allocation3], 256  }
   0xc   :  { %1128 = vsyncadd [#allocation3], 4294967040 }
   0xd   :  { %1129 = dma.done.wait [#allocation6], 1024  }
   0xe   :  { %1130 = vsyncadd [#allocation6], 4294966272  ;;  %v67_v0 = vld [vmem:[#allocation5 + $0x18] sm:$0xff]  ;;  %v66_v1 = vld [vmem:[#allocation5 + $0x10] sm:$0xff]  ;;  %vm68_vm0 = vcmask 261120   ;;  %s1138_s2 = smov 120   ;;  %v98_v10 = vlaneseq }
   0xf   :  { %87 = vmatpush.msra.mxu0 %v67_v0  ;;  %v65_v2 = vld [vmem:[#allocation5 + $0x8] sm:$0xff]  ;;  %v64_v3 = vld [vmem:[#allocation5] sm:$0xff]  ;;  %v62_v4 = vld [vmem:[#allocation2] sm:$0xff]  ;;  %s1139_s27 = smov 96   ;;  %s1140_s28 = smov 88   ;;  %vm110_vm1 = vcmask 64512  }
  0x10   :  { %v63_v6 = vld [vmem:[#allocation2 + $0x8] sm:$0xff]  ;;  %v99_v11 = vshrl.u32 %v98_v10, 7  ;;  %v101_v12 = vand.u32 127, %v98_v10  ;;  %s1141_s29 = smov 112   ;;  %s1142_s30 = smov 72   ;;  %v103_v61 = vld [vmem:[#allocation7] sm:$0xff] }
  0x11   :  { %88 = vmatpush.msra.mxu0 %v66_v1  ;;  %s1143_s4 = smov 64   ;;  %s1144_s5 = smov 56   ;;  %v104_v62 = vld [vmem:[#allocation7 + $0x8] sm:$0xff] }
  0x12   :  { %vm1202_vm2 = vcmp.gt.s32.totalorder %v101_v12, %v99_v11  ;;  %s1145_s6 = smov 80   ;;  %s1146_s7 = smov 48  }
  0x13   :  { %89 = vmatpush.msra.mxu0 %v65_v2  ;;  %s1147_s8 = smov 104   ;;  %s1148_s9 = smov 40  }
  0x14   :  { %s1149_s10 = smov [#allocation8]   ;;  %s934_s14 = sshll.u32 %s1336_s3, 4  ;;  %s935_s14 = int_to_ptr.hbm [resolvable:$true] %s934_s14 }
  0x15   :  { %90 = vmatpush.msra.mxu0 %v64_v3  ;;  %s932_s11 = sshll.u32 %s1149_s10, 4  ;;  %s933_s11 = int_to_ptr.vmem [resolvable:$true] %s932_s11 }
  0x16   :  { %948 = vmatmul.msk.f32.vlgmr.msra.gmra.mxu0 %vm68_vm0, %v62_v4 }
  0x1e   :  { %949 = vmatmul.msk.f32.gmra.mxu0 %vm68_vm0, %v63_v6 }
  0x93   :  { %v1189_v5 = vpop.f32.mrf.mxu0 }
  0x94   :  { %186 = vrot.lane.b32.xlu1 %v1189_v5, %s1138_s2  ;;  %108 = vrot.lane.b32.xlu0 %v1189_v5, %s1139_s27 }
  0x9b   :  { %v1214_v20 = vpop.f32.mrf.mxu0 }
  0x9c   :  { %188 = vrot.lane.b32.xlu0 %v1189_v5, %s1140_s28 }
 0x106   :  { %v109_v7 = vpop.permute.xlu0 %108  ;;  %v187_v9 = vpop.permute.xlu1 %186 }
 0x107   :  { %950 = vmatpush.xpose.msk.msra.mxu1 %vm110_vm1, %v109_v7 }
 0x10a   :  { %951 = vmatmul.msk.f32.vlgmr.msra.gmra.mxu1 %vm110_vm1, %v1189_v5 }
 0x10b   :  { %283 = vmatpush.msrb.mxu1 %v104_v62 }
 0x10e   :  { %v189_v8 = vpop.permute.xlu0 %188 }
 0x10f   :  { %953 = vmatpush.xpose.msk.msra.mxu3 %vm110_vm1, %v189_v8 }
 0x112   :  { %954 = vmatmul.msk.f32.vlgmr.msra.gmra.mxu3 %vm110_vm1, %v187_v9 }
 0x113   :  { %306 = vmatpush.msrb.mxu3 %v103_v61 }
 0x187   :  { %v132_v14 = vpop.f32.mrf.mxu1 }
 0x188   :  { %v135_v15 = vsel %vm1202_vm2, -inf, %v132_v14 }
 0x189   :  { %v136_v16 = vsel %vm110_vm1, %v135_v15, -inf }
 0x18a   :  { %137 = vmax.xlane.f32.xlu1 %v136_v16 }
 0x195   :  { %v211_v17 = vpop.f32.mrf.mxu3 }
 0x196   :  { %v214_v18 = vsel %vm1202_vm2, -inf, %v211_v17 }
 0x197   :  { %v215_v19 = vsel %vm110_vm1, %v214_v18, -inf }
 0x198   :  { %216 = vmax.xlane.f32.xlu2 %v215_v19 }
 0x1a3   :  { %311 = vrot.lane.b32.xlu1 %v1189_v5, %s1141_s29 }
 0x1ab   :  { %519 = vrot.lane.b32.xlu1 %v1214_v20, %s1139_s27 }
 0x1b3   :  { %416 = vrot.lane.b32.xlu1 %v1189_v5, %s1142_s30 }
 0x1fd   :  { %v138_v21 = vpop.xlane.xlu1 %137 }
 0x1fe   :  { %v139_v22 = vsub.f32 %v135_v15, %v138_v21 }
 0x200   :  { %v140_v23 = vmul.f32 1.442695, %v139_v22 }
 0x202   :  { %999 = vpow2.f32 %v140_v23 }
 0x208   :  { %v1000_v24 = vpop.eup %999 }
 0x209   :  { %v142_v25 = vsel %vm110_vm1, %v1000_v24, 0.0 }
 0x20a   :  { %143 = vadd.xlane.f32.xlu2 %v142_v25 }
 0x20b   :  { %v217_v26 = vpop.xlane.xlu2 %216 }
 0x20c   :  { %v218_v27 = vsub.f32 %v214_v18, %v217_v26 }
 0x20e   :  { %v219_v28 = vmul.f32 1.442695, %v218_v27  ;;  %v105_v27 = vld [vmem:[#allocation7 + $0x10] sm:$0xff] }
 0x20f   :  { %408 = vmatpush.msra.mxu3 %v105_v27 }
 0x210   :  { %1001 = vpow2.f32 %v219_v28 }
 0x215   :  { %v312_v29 = vpop.permute.xlu1 %311 }
 0x216   :  { %v1002_v30 = vpop.eup %1001 }
 0x217   :  { %v221_v31 = vsel %vm110_vm1, %v1002_v30, 0.0 }
 0x218   :  { %222 = vadd.xlane.f32.xlu0 %v221_v31 }
 0x21d   :  { %v1221_v32 = vpop.permute.xlu1 %519 }
 0x222   :  { %160 = vrot.lane.b32.xlu2 %v1189_v5, %s1143_s4 }
 0x225   :  { %v417_v33 = vpop.permute.xlu1 %416 }
 0x226   :  { %962 = vmatpush.xpose.msk.msrb.mxu0 %vm110_vm1, %v417_v33 }
 0x22a   :  { %239 = vrot.lane.b32.xlu2 %v1189_v5, %s1144_s5 }
 0x232   :  { %313 = vrot.lane.b32.xlu2 %v1189_v5, %s1145_s6 }
 0x27d   :  { %v144_v34 = vpop.xlane.xlu2 %143 }
 0x27e   :  { %1003 = vrcp.f32 %v144_v34  ;;  %v156_v39 = vand.u32 2147483648, %v144_v34  ;;  %v154_v41 = vand.u32 2147483647, %v144_v34  ;;  %vm150_vm4 = vweird.f32 %v144_v34 }
 0x280   :  { %v157_v44 = vor.u32 1.1754944e-38, %v156_v39  ;;  %vm155_vm6 = vcmp.eq.f32.partialorder %v154_v41, 8.507059e+37 }
 0x284   :  { %v1004_v35 = vpop.eup %1003 }
 0x285   :  { %v146_v36 = vmul.f32 %v1004_v35, %v144_v34  ;;  %v161_v37 = vpop.permute.xlu2 %160  ;;  %vm151_vm3 = vweird.f32 %v1004_v35 }
 0x286   :  { %181 = vmatpush.msra.mxu2 %v161_v37  ;;  %vm152_vm5 = vmor %vm150_vm4, %vm151_vm3 }
 0x287   :  { %v147_v38 = vsub.f32 1.0, %v146_v36 }
 0x289   :  { %v148_v40 = vmul.f32 %v1004_v35, %v147_v38 }
 0x28b   :  { %v223_v42 = vpop.xlane.xlu0 %222  ;;  %v149_v43 = vadd.f32 %v1004_v35, %v148_v40 }
 0x28c   :  { %1005 = vrcp.f32 %v223_v42  ;;  %v235_v53 = vand.u32 2147483648, %v223_v42  ;;  %v233_v55 = vand.u32 2147483647, %v223_v42  ;;  %vm229_vm8 = vweird.f32 %v223_v42 }
 0x28d   :  { %v240_v45 = vpop.permute.xlu2 %239  ;;  %v153_v46 = vsel %vm152_vm5, %v1004_v35, %v149_v43 }
 0x28e   :  { %260 = vmatpush.msrb.mxu2 %v240_v45  ;;  %v158_v47 = vsel %vm155_vm6, %v157_v44, %v153_v46  ;;  %v236_v57 = vor.u32 1.1754944e-38, %v235_v53  ;;  %vm234_vm10 = vcmp.eq.f32.partialorder %v233_v55, 8.507059e+37 }
 0x28f   :  { %v159_v48 = vmul.f32 %v1000_v24, %v158_v47 }
 0x291   :  { %952 = vmatmul.msk.f32.vlgmr.msra.gmra.mxu2 %vm110_vm1, %v159_v48 }
 0x292   :  { %v1006_v49 = vpop.eup %1005 }
 0x293   :  { %v225_v50 = vmul.f32 %v1006_v49, %v223_v42  ;;  %vm230_vm7 = vweird.f32 %v1006_v49 }
 0x294   :  { %vm231_vm9 = vmor %vm229_vm8, %vm230_vm7 }
 0x295   :  { %v226_v51 = vsub.f32 1.0, %v225_v50  ;;  %v314_v52 = vpop.permute.xlu2 %313 }
 0x296   :  { %958 = vmatpush.xpose.msk.msra.mxu2 %vm110_vm1, %v314_v52 }
 0x297   :  { %v227_v54 = vmul.f32 %v1006_v49, %v226_v51 }
 0x299   :  { %v228_v56 = vadd.f32 %v1006_v49, %v227_v54 }
 0x29b   :  { %v232_v58 = vsel %vm231_vm9, %v1006_v49, %v228_v56 }
 0x29c   :  { %v237_v59 = vsel %vm234_vm10, %v236_v57, %v232_v58 }
 0x29d   :  { %v238_v60 = vmul.f32 %v1002_v30, %v237_v59 }
 0x29f   :  { %955 = vmatmul.msk.f32.vlgmr.msrb.gmra.mxu2 %vm110_vm1, %v238_v60 }
 0x2a7   :  { %959 = vmatmul.msk.f32.vlgmr.msra.gmra.mxu2 %vm110_vm1, %v312_v29 }
 0x314   :  { %v183_v63 = vpop.f32.mrf.mxu2 }
 0x315   :  { %957 = vmatmul.msk.f32.vlgmr.msrb.gmra.mxu3 %vm110_vm1, %v183_v63 }
 0x316   :  { %966 = vmatpush.xpose.msk.msrb.mxu3 %vm110_vm1, %v1221_v32 }
 0x322   :  { %v262_v0 = vpop.f32.mrf.mxu2 }
 0x323   :  { %956 = vmatmul.msk.f32.vlgmr.msrb.gmra.mxu1 %vm110_vm1, %v262_v0 }
 0x32a   :  { %v336_v1 = vpop.f32.mrf.mxu2 }
 0x32b   :  { %v339_v2 = vsel %vm1202_vm2, -inf, %v336_v1 }
 0x32c   :  { %v340_v3 = vsel %vm110_vm1, %v339_v2, -inf }
 0x32d   :  { %341 = vmax.xlane.f32.xlu2 %v340_v3 }
 0x345   :  { %570 = vrot.lane.b32.xlu2 %v1214_v20, %s1143_s4 }
 0x398   :  { %v1260_v32 = vpop.f32.mrf.mxu3 }
 0x3a0   :  { %v342_v4 = vpop.xlane.xlu2 %341  ;;  %v1250_v28 = vpop.f32.mrf.mxu1 }
 0x3a1   :  { %v343_v6 = vsub.f32 %v339_v2, %v342_v4 }
 0x3a3   :  { %v344_v7 = vmul.f32 1.442695, %v343_v6 }
 0x3a5   :  { %1007 = vpow2.f32 %v344_v7 }
 0x3a8   :  { %v571_v10 = vpop.permute.xlu2 %570 }
 0x3a9   :  { %591 = vmatpush.msra.mxu0 %v571_v10 }
 0x3ab   :  { %v1008_v8 = vpop.eup %1007 }
 0x3ac   :  { %v346_v9 = vsel %vm110_vm1, %v1008_v8, 0.0 }
 0x3ad   :  { %347 = vadd.xlane.f32.xlu0 %v346_v9 }
 0x3c1   :  { %364 = vrot.lane.b32.xlu0 %v1189_v5, %s1146_s7 }
 0x3c9   :  { %414 = vrot.lane.b32.xlu0 %v1189_v5, %s1147_s8 }
 0x420   :  { %v348_v11 = vpop.xlane.xlu0 %347 }
 0x421   :  { %1009 = vrcp.f32 %v348_v11  ;;  %v360_v16 = vand.u32 2147483648, %v348_v11  ;;  %v358_v18 = vand.u32 2147483647, %v348_v11  ;;  %vm354_vm12 = vweird.f32 %v348_v11 }
 0x423   :  { %v361_v21 = vor.u32 1.1754944e-38, %v360_v16  ;;  %vm359_vm14 = vcmp.eq.f32.partialorder %v358_v18, 8.507059e+37 }
 0x427   :  { %v1010_v12 = vpop.eup %1009 }
 0x428   :  { %v350_v14 = vmul.f32 %v1010_v12, %v348_v11  ;;  %vm355_vm11 = vweird.f32 %v1010_v12 }
 0x429   :  { %vm356_vm13 = vmor %vm354_vm12, %vm355_vm11 }
 0x42a   :  { %v351_v15 = vsub.f32 1.0, %v350_v14 }
 0x42c   :  { %v352_v17 = vmul.f32 %v1010_v12, %v351_v15  ;;  %v1288_v15 = vld [vmem:[#allocation7 + $0x18] sm:$0xff] }
 0x42e   :  { %v353_v19 = vadd.f32 %v1010_v12, %v352_v17 }
 0x430   :  { %v357_v22 = vsel %vm356_vm13, %v1010_v12, %v353_v19 }
 0x431   :  { %v362_v23 = vsel %vm359_vm14, %v361_v21, %v357_v22 }
 0x432   :  { %v363_v24 = vmul.f32 %v1008_v8, %v362_v23 }
 0x433   :  { %v365_v25 = vpop.permute.xlu0 %364 }
 0x434   :  { %385 = vmatpush.msra.mxu1 %v365_v25 }
 0x435   :  { %960 = vmatmul.msk.f32.vlgmr.msra.gmra.mxu1 %vm110_vm1, %v363_v24 }
 0x436   :  { %511 = vmatpush.msrb.mxu1 %v1288_v15 }
 0x43b   :  { %v415_v26 = vpop.permute.xlu0 %414 }
 0x43c   :  { %963 = vmatmul.msk.f32.vlgmr.msrb.gmra.mxu0 %vm110_vm1, %v415_v26 }
 0x43d   :  { %716 = vmatpush.msrb.mxu0 %v103_v61 }
 0x4b2   :  { %v387_v29 = vpop.f32.mrf.mxu1 }
 0x4b3   :  { %961 = vmatmul.msk.f32.vlgmr.msra.gmra.mxu3 %vm110_vm1, %v387_v29 }
 0x4b4   :  { %693 = vmatpush.msra.mxu3 %v104_v62 }
 0x4b9   :  { %v439_v30 = vpop.f32.mrf.mxu0 }
 0x4ba   :  { %v442_v31 = vsel %vm1202_vm2, -inf, %v439_v30 }
 0x4bb   :  { %967 = vmatmul.msk.f32.vlgmr.msrb.gmra.mxu3 %vm110_vm1, %v1214_v20  ;;  %v443_v33 = vsel %vm110_vm1, %v442_v31, -inf }
 0x4bc   :  { %444 = vmax.xlane.f32.xlu2 %v443_v33  ;;  %818 = vmatpush.msrb.mxu3 %v105_v27  ;;  %v309_v27 = vadd.f32 %v1260_v32, %v1250_v28 }
 0x4d4   :  { %723 = vrot.lane.b32.xlu2 %v1214_v20, %s1145_s6 }
 0x52f   :  { %v445_v34 = vpop.xlane.xlu2 %444 }
 0x530   :  { %v446_v36 = vsub.f32 %v442_v31, %v445_v34 }
 0x532   :  { %v447_v37 = vmul.f32 1.442695, %v446_v36 }
 0x534   :  { %1011 = vpow2.f32 %v447_v37 }
 0x536   :  { %v1262_v35 = vpop.f32.mrf.mxu3 }
 0x537   :  { %v724_v11 = vpop.permute.xlu2 %723  ;;  %v413_v29 = vadd.f32 %v1262_v35, %v309_v27 }
 0x53a   :  { %v1012_v41 = vpop.eup %1011 }
 0x53b   :  { %v449_v42 = vsel %vm110_vm1, %v1012_v41, 0.0 }
 0x53e   :  { %v542_v38 = vpop.f32.mrf.mxu3 }
 0x53f   :  { %v545_v39 = vsel %vm1202_vm2, -inf, %v542_v38 }
 0x540   :  { %v546_v40 = vsel %vm110_vm1, %v545_v39, -inf }
 0x541   :  { %547 = vmax.xlane.f32.xlu1 %v546_v40 }
 0x549   :  { %450 = vadd.xlane.f32.xlu1 %v449_v42 }
 0x562   :  { %598 = vrot.lane.b32.xlu1 %v1214_v20, %s1140_s28 }
 0x56a   :  { %826 = vrot.lane.b32.xlu1 %v1214_v20, %s1142_s30 }
 0x5b4   :  { %v548_v43 = vpop.xlane.xlu1 %547 }
 0x5b5   :  { %v549_v44 = vsub.f32 %v545_v39, %v548_v43 }
 0x5b7   :  { %v550_v45 = vmul.f32 1.442695, %v549_v44 }
 0x5b9   :  { %1013 = vpow2.f32 %v550_v45 }
 0x5bc   :  { %v451_v48 = vpop.xlane.xlu1 %450 }
 0x5bd   :  { %1015 = vrcp.f32 %v451_v48  ;;  %v463_v56 = vand.u32 2147483648, %v451_v48  ;;  %vm457_vm3 = vweird.f32 %v451_v48  ;;  %v461_v59 = vand.u32 2147483647, %v451_v48 }
 0x5bf   :  { %v1014_v46 = vpop.eup %1013  ;;  %v464_v0 = vor.u32 1.1754944e-38, %v463_v56  ;;  %vm462_vm7 = vcmp.eq.f32.partialorder %v461_v59, 8.507059e+37 }
 0x5c0   :  { %v552_v47 = vsel %vm110_vm1, %v1014_v46, 0.0 }
 0x5c1   :  { %553 = vadd.xlane.f32.xlu0 %v552_v47 }
 0x5c3   :  { %v1016_v49 = vpop.eup %1015 }
 0x5c4   :  { %v453_v50 = vmul.f32 %v1016_v49, %v451_v48  ;;  %vm458_vm15 = vweird.f32 %v1016_v49 }
 0x5c5   :  { %vm459_vm4 = vmor %vm457_vm3, %vm458_vm15 }
 0x5c6   :  { %v454_v52 = vsub.f32 1.0, %v453_v50 }
 0x5c8   :  { %v455_v53 = vmul.f32 %v1016_v49, %v454_v52 }
 0x5d4   :  { %v599_v57 = vpop.permute.xlu1 %598 }
 0x5d5   :  { %467 = vrot.lane.b32.xlu0 %v1189_v5, %s1148_s9  ;;  %v456_v5 = vadd.f32 %v1016_v49, %v455_v53 }
 0x5d7   :  { %v460_v63 = vsel %vm459_vm4, %v1016_v49, %v456_v5 }
 0x5d8   :  { %v465_v3 = vsel %vm462_vm7, %v464_v0, %v460_v63 }
 0x5d9   :  { %v466_v9 = vmul.f32 %v1012_v41, %v465_v3 }
 0x5dc   :  { %v827_v10 = vpop.permute.xlu1 %826 }
 0x5dd   :  { %596 = vrot.lane.b32.xlu0 %v1214_v20, %s1138_s2 }
 0x5e5   :  { %721 = vrot.lane.b32.xlu0 %v1214_v20, %s1141_s29 }
 0x5ed   :  { %824 = vrot.lane.b32.xlu0 %v1214_v20, %s1147_s8 }
 0x634   :  { %v554_v51 = vpop.xlane.xlu0 %553 }
 0x635   :  { %1017 = vrcp.f32 %v554_v51  ;;  %v566_v60 = vand.u32 2147483648, %v554_v51  ;;  %v564_v62 = vand.u32 2147483647, %v554_v51  ;;  %vm560_vm6 = vweird.f32 %v554_v51 }
 0x637   :  { %v567_v2 = vor.u32 1.1754944e-38, %v566_v60  ;;  %vm565_vm9 = vcmp.eq.f32.partialorder %v564_v62, 8.507059e+37 }
 0x63b   :  { %v1018_v54 = vpop.eup %1017 }
 0x63c   :  { %v556_v55 = vmul.f32 %v1018_v54, %v554_v51  ;;  %vm561_vm5 = vweird.f32 %v1018_v54 }
 0x63d   :  { %vm562_vm8 = vmor %vm560_vm6, %vm561_vm5 }
 0x63e   :  { %v557_v58 = vsub.f32 1.0, %v556_v55 }
 0x640   :  { %v558_v61 = vmul.f32 %v1018_v54, %v557_v58 }
 0x642   :  { %v559_v1 = vadd.f32 %v1018_v54, %v558_v61 }
 0x644   :  { %v563_v4 = vsel %vm562_vm8, %v1018_v54, %v559_v1 }
 0x645   :  { %v568_v6 = vsel %vm565_vm9, %v567_v2, %v563_v4 }
 0x646   :  { %v569_v7 = vmul.f32 %v1014_v46, %v568_v6 }
 0x647   :  { %v468_v8 = vpop.permute.xlu0 %467 }
 0x648   :  { %488 = vmatpush.msrb.mxu2 %v468_v8  ;;  %968 = vmatmul.msk.f32.vlgmr.msra.gmra.mxu0 %vm110_vm1, %v569_v7 }
 0x649   :  { %978 = vmatpush.xpose.msk.msra.mxu0 %vm110_vm1, %v827_v10  ;;  %964 = vmatmul.msk.f32.vlgmr.msrb.gmra.mxu2 %vm110_vm1, %v466_v9 }
 0x64a   :  { %969 = vmatpush.xpose.msk.msra.mxu2 %vm110_vm1, %v599_v57 }
 0x64e   :  { %974 = vmatpush.xpose.msk.msrb.mxu2 %vm110_vm1, %v724_v11 }
 0x64f   :  { %v597_v12 = vpop.permute.xlu0 %596 }
 0x651   :  { %970 = vmatmul.msk.f32.vlgmr.msra.gmra.mxu2 %vm110_vm1, %v597_v12 }
 0x657   :  { %v722_v14 = vpop.permute.xlu0 %721 }
 0x659   :  { %975 = vmatmul.msk.f32.vlgmr.msrb.gmra.mxu2 %vm110_vm1, %v722_v14 }
 0x65f   :  { %v825_v18 = vpop.permute.xlu0 %824 }
 0x6c5   :  { %v593_v16 = vpop.f32.mrf.mxu0 }
 0x6c6   :  { %973 = vmatmul.msk.f32.vlgmr.msrb.gmra.mxu0 %vm110_vm1, %v593_v16 }
 0x6cc   :  { %v490_v17 = vpop.f32.mrf.mxu2 }
 0x6cd   :  { %965 = vmatmul.msk.f32.vlgmr.msrb.gmra.mxu1 %vm110_vm1, %v490_v17 }
 0x6ce   :  { %979 = vmatmul.msk.f32.vlgmr.msra.gmra.mxu0 %vm110_vm1, %v825_v18 }
 0x6d4   :  { %v621_v19 = vpop.f32.mrf.mxu2 }
 0x6d5   :  { %v624_v21 = vsel %vm1202_vm2, -inf, %v621_v19 }
 0x6d6   :  { %v625_v22 = vsel %vm110_vm1, %v624_v21, -inf }
 0x6d7   :  { %626 = vmax.xlane.f32.xlu1 %v625_v22 }
 0x6dc   :  { %v746_v23 = vpop.f32.mrf.mxu2 }
 0x6dd   :  { %v749_v24 = vsel %vm1202_vm2, -inf, %v746_v23 }
 0x6de   :  { %v750_v25 = vsel %vm110_vm1, %v749_v24, -inf }
 0x6df   :  { %751 = vmax.xlane.f32.xlu0 %v750_v25 }
 0x743   :  { %v1300_v26 = vpop.f32.mrf.mxu0 }
 0x74a   :  { %v513_v30 = vpop.f32.mrf.mxu1  ;;  %v627_v31 = vpop.xlane.xlu1 %626 }
 0x74b   :  { %v516_v33 = vadd.f32 %v513_v30, %v413_v29  ;;  %v628_v34 = vsub.f32 %v624_v21, %v627_v31  ;;  %v849_v36 = vpop.f32.mrf.mxu0 }
 0x74c   :  { %v852_v37 = vsel %vm1202_vm2, -inf, %v849_v36 }
 0x74d   :  { %517 = vst.msk [vmem:[#allocation8] sm:$0xff] %vm68_vm0, %v516_v33  ;;  %v629_v38 = vmul.f32 1.442695, %v628_v34  ;;  %v853_v39 = vsel %vm110_vm1, %v852_v37, -inf }
 0x74e   :  { %854 = vmax.xlane.f32.xlu2 %v853_v39 }
 0x74f   :  { %1019 = vpow2.f32 %v629_v38 }
 0x752   :  { %v752_v40 = vpop.xlane.xlu0 %751 }
 0x753   :  { %v753_v41 = vsub.f32 %v749_v24, %v752_v40 }
 0x755   :  { %v1020_v28 = vpop.eup %1019  ;;  %v754_v32 = vmul.f32 1.442695, %v753_v41 }
 0x756   :  { %v631_v35 = vsel %vm110_vm1, %v1020_v28, 0.0 }
 0x757   :  { %1021 = vpow2.f32 %v754_v32  ;;  %632 = vadd.xlane.f32.xlu1 %v631_v35 }
 0x75d   :  { %v1022_v42 = vpop.eup %1021 }
 0x75e   :  { %v756_v43 = vsel %vm110_vm1, %v1022_v42, 0.0 }
 0x75f   :  { %757 = vadd.xlane.f32.xlu0 %v756_v43 }
 0x766   :  { %649 = vrot.lane.b32.xlu2 %v1214_v20, %s1144_s5 }
 0x773   :  { %774 = vrot.lane.b32.xlu0 %v1214_v20, %s1146_s7 }
 0x7c1   :  { %v855_v13 = vpop.xlane.xlu2 %854 }
 0x7c2   :  { %v856_v44 = vsub.f32 %v852_v37, %v855_v13 }
 0x7c4   :  { %v857_v45 = vmul.f32 1.442695, %v856_v44 }
 0x7c6   :  { %1023 = vpow2.f32 %v857_v45 }
 0x7c9   :  { %v650_v46 = vpop.permute.xlu2 %649 }
 0x7ca   :  { %670 = vmatpush.msra.mxu1 %v650_v46  ;;  %v633_v47 = vpop.xlane.xlu1 %632 }
 0x7cb   :  { %1025 = vrcp.f32 %v633_v47  ;;  %v645_v54 = vand.u32 2147483648, %v633_v47  ;;  %v643_v5 = vand.u32 2147483647, %v633_v47  ;;  %vm639_vm10 = vweird.f32 %v633_v47 }
 0x7cc   :  { %v1024_v48 = vpop.eup %1023 }
 0x7cd   :  { %v859_v49 = vsel %vm110_vm1, %v1024_v48, 0.0  ;;  %v646_v58 = vor.u32 1.1754944e-38, %v645_v54  ;;  %vm644_vm12 = vcmp.eq.f32.partialorder %v643_v5, 8.507059e+37 }
 0x7ce   :  { %860 = vadd.xlane.f32.xlu1 %v859_v49 }
 0x7d1   :  { %v1026_v50 = vpop.eup %1025 }
 0x7d2   :  { %v635_v51 = vmul.f32 %v1026_v50, %v633_v47  ;;  %v758_v52 = vpop.xlane.xlu0 %757  ;;  %vm640_vm2 = vweird.f32 %v1026_v50 }
 0x7d3   :  { %1027 = vrcp.f32 %v758_v52  ;;  %vm641_vm11 = vmor %vm639_vm10, %vm640_vm2  ;;  %v770_v0 = vand.u32 2147483648, %v758_v52  ;;  %v768_v2 = vand.u32 2147483647, %v758_v52  ;;  %vm764_vm14 = vweird.f32 %v758_v52 }
 0x7d4   :  { %v636_v53 = vsub.f32 1.0, %v635_v51 }
 0x7d5   :  { %v771_v4 = vor.u32 1.1754944e-38, %v770_v0  ;;  %vm769_vm3 = vcmp.eq.f32.partialorder %v768_v2, 8.507059e+37 }
 0x7d6   :  { %v637_v55 = vmul.f32 %v1026_v50, %v636_v53 }
 0x7d8   :  { %v638_v56 = vadd.f32 %v1026_v50, %v637_v55 }
 0x7d9   :  { %v1028_v57 = vpop.eup %1027 }
 0x7da   :  { %v642_v59 = vsel %vm641_vm11, %v1026_v50, %v638_v56  ;;  %v760_v60 = vmul.f32 %v1028_v57, %v758_v52  ;;  %vm765_vm13 = vweird.f32 %v1028_v57 }
 0x7db   :  { %v647_v61 = vsel %vm644_vm12, %v646_v58, %v642_v59  ;;  %vm766_vm15 = vmor %vm764_vm14, %vm765_vm13 }
 0x7dc   :  { %v761_v62 = vsub.f32 1.0, %v760_v60  ;;  %v648_v63 = vmul.f32 %v1020_v28, %v647_v61 }
 0x7de   :  { %v762_v1 = vmul.f32 %v1028_v57, %v761_v62  ;;  %971 = vmatmul.msk.f32.vlgmr.msra.gmra.mxu1 %vm110_vm1, %v648_v63 }
 0x7e0   :  { %v763_v3 = vadd.f32 %v1028_v57, %v762_v1 }
 0x7e2   :  { %v767_v6 = vsel %vm766_vm15, %v1028_v57, %v763_v3 }
 0x7e3   :  { %v772_v7 = vsel %vm769_vm3, %v771_v4, %v767_v6 }
 0x7e4   :  { %v773_v8 = vmul.f32 %v1022_v42, %v772_v7 }
 0x7e5   :  { %v775_v9 = vpop.permute.xlu0 %774 }
 0x7e6   :  { %795 = vmatpush.msrb.mxu1 %v775_v9 }
 0x7e7   :  { %877 = vrot.lane.b32.xlu1 %v1214_v20, %s1148_s9  ;;  %976 = vmatmul.msk.f32.vlgmr.msrb.gmra.mxu1 %vm110_vm1, %v773_v8 }
 0x7e8   :  { %921 = vmatpush.msra.mxu1 %v1288_v15 }
 0x841   :  { %v861_v10 = vpop.xlane.xlu1 %860 }
 0x842   :  { %1029 = vrcp.f32 %v861_v10  ;;  %v873_v18 = vand.u32 2147483648, %v861_v10  ;;  %vm867_vm5 = vweird.f32 %v861_v10  ;;  %v871_v19 = vand.u32 2147483647, %v861_v10 }
 0x844   :  { %v874_v22 = vor.u32 1.1754944e-38, %v873_v18  ;;  %vm872_vm7 = vcmp.eq.f32.partialorder %v871_v19, 8.507059e+37 }
 0x848   :  { %v1030_v11 = vpop.eup %1029 }
 0x849   :  { %v863_v12 = vmul.f32 %v1030_v11, %v861_v10  ;;  %vm868_vm4 = vweird.f32 %v1030_v11 }
 0x84a   :  { %vm869_vm6 = vmor %vm867_vm5, %vm868_vm4 }
 0x84b   :  { %v864_v14 = vsub.f32 1.0, %v863_v12 }
 0x84d   :  { %v865_v16 = vmul.f32 %v1030_v11, %v864_v14 }
 0x84f   :  { %v866_v17 = vadd.f32 %v1030_v11, %v865_v16 }
 0x851   :  { %v870_v21 = vsel %vm869_vm6, %v1030_v11, %v866_v17 }
 0x852   :  { %v875_v20 = vsel %vm872_vm7, %v874_v22, %v870_v21 }
 0x853   :  { %v876_v24 = vmul.f32 %v1024_v48, %v875_v20 }
 0x859   :  { %v878_v23 = vpop.permute.xlu1 %877 }
 0x85a   :  { %898 = vmatpush.msra.mxu2 %v878_v23 }
 0x85b   :  { %v672_v15 = vpop.f32.mrf.mxu1  ;;  %980 = vmatmul.msk.f32.vlgmr.msra.gmra.mxu2 %vm110_vm1, %v876_v24 }
 0x85c   :  { %972 = vmatmul.msk.f32.vlgmr.msra.gmra.mxu3 %vm110_vm1, %v672_v15 }
 0x864   :  { %v797_v25 = vpop.f32.mrf.mxu1 }
 0x865   :  { %977 = vmatmul.msk.f32.vlgmr.msrb.gmra.mxu3 %vm110_vm1, %v797_v25 }
 0x8de   :  { %v900_v27 = vpop.f32.mrf.mxu2 }
 0x8df   :  { %981 = vmatmul.msk.f32.vlgmr.msra.gmra.mxu1 %vm110_vm1, %v900_v27  ;;  %v695_v29 = vpop.f32.mrf.mxu3 }
 0x8e0   :  { %v719_v31 = vadd.f32 %v1300_v26, %v695_v29 }
 0x8e8   :  { %v820_v30 = vpop.f32.mrf.mxu3 }
 0x8e9   :  { %v823_v33 = vadd.f32 %v820_v30, %v719_v31 }
 0x95c   :  { %v923_v34 = vpop.f32.mrf.mxu1 }
 0x95d   :  { %v926_v36 = vadd.f32 %v923_v34, %v823_v33 }
 0x95f   :  { %927 = vst.msk [vmem:[#allocation8 + $0x8] sm:$0xff] %vm68_vm0, %v926_v36 }
 0x960   :  { %940 = dma.vmem_to_hbm [thread:$0]  %s933_s11, 256, %s935_s14, [#allocation4], %s1134_s20, %s1134_s20, %s1135_s21  }
 0x961   :  { %1131 = dma.done.wait [#allocation4], 256  }
 0x962   :  { %1132 = vsyncadd [#allocation4], 4294967040 }
 0x963   :  { %945 = vsyncpa [#allocation3], 1 }
 0x964   :  { %946 = vsyncpa [#allocation6], 1 }
 0x965   :  { %947 = vsyncpa [#allocation4], 1 }

</bundles_post_ra>
